<compile_context>
chip_gen: v6e
topology: v6e:2x2x1
jax: 0.10.0
libtpu: 0.0.40
codegen_flags: <defaults>
</compile_context>

<pallas_src>
import jax
import jax.numpy as jnp
from jax.experimental import pallas as pl
from jax.experimental.pallas import tpu as pltpu

BN_EPS = 1e-5
NORM_EPS = 1e-12


def neck_kernel(x_ref, w_ref, b_ref, alpha_ref, emb_ref, embn_ref):
    # Linear (BatchNorm1d already folded into w/b in the wrapper)
    h = jnp.dot(x_ref[...], w_ref[...], preferred_element_type=jnp.float32)
    h = h + b_ref[...]
    # PReLU (single learnable scalar, read from SMEM)
    a = alpha_ref[0]
    emb = jnp.where(h > 0, h, a * h)
    emb_ref[...] = emb.astype(emb_ref.dtype)
    # F.normalize(x_emb, dim=1): x / max(||x||_2, 1e-12)  (for the ArcMargin head)
    nrm = jnp.sqrt(jnp.sum(emb * emb, axis=-1, keepdims=True))
    embn_ref[...] = (emb / jnp.maximum(nrm, NORM_EPS)).astype(embn_ref.dtype)


def head_kernel(embn_ref, wt_ref, conf_ref, cls_ref, m_sc, l_sc, idx_sc):
    c = pl.program_id(1)
    tc = wt_ref.shape[1]

    @pl.when(c == 0)
    def _():
        m_sc[...] = jnp.full_like(m_sc, -jnp.inf)
        l_sc[...] = jnp.zeros_like(l_sc)
        idx_sc[...] = jnp.zeros_like(idx_sc)

    # cosine logits for this class tile (weight rows pre-normalized, pre-transposed)
    s = jnp.dot(embn_ref[...], wt_ref[...], preferred_element_type=jnp.float32)

    # tile max + first-index-of-max (matches torch.max tie behavior)
    tmax = jnp.max(s, axis=-1, keepdims=True)
    lane = jax.lax.broadcasted_iota(jnp.int32, s.shape, 1) + c * tc
    tidx = jnp.min(jnp.where(s == tmax, lane, jnp.int32(2**31 - 1)),
                   axis=-1, keepdims=True)

    # online softmax statistics across class tiles
    m_prev = m_sc[...]
    m_new = jnp.maximum(m_prev, tmax)
    idx_sc[...] = jnp.where(tmax > m_prev, tidx, idx_sc[...])
    l_sc[...] = (l_sc[...] * jnp.exp(m_prev - m_new)
                 + jnp.sum(jnp.exp(s - m_new), axis=-1, keepdims=True))
    m_sc[...] = m_new

    @pl.when(c == pl.num_programs(1) - 1)
    def _():
        # max(softmax(logits)) = exp(m - m) / sum_j exp(logit_j - m) = 1 / l
        conf_ref[...] = (1.0 / l_sc[...]).astype(conf_ref.dtype)
        cls_ref[...] = idx_sc[...]


def hybrid_swin_forward(feats, w_neck, b_neck, bn_gamma, bn_beta, bn_mean,
                        bn_var, prelu_alpha, w_head, *, tb=8, tc=128):
    """feats: (B, num_features) backbone output.  Returns the module's output dict."""
    B, F = feats.shape
    E = w_neck.shape[0]
    C = w_head.shape[0]
    assert C % tc == 0, "n_classes must be a multiple of the class tile"

    # Fold BatchNorm1d (inference, running stats) into the neck Linear.
    scale = bn_gamma * jax.lax.rsqrt(bn_var + BN_EPS)                 # (E,)
    w_f = (w_neck * scale[:, None]).T                                 # (F, E)
    b_f = ((b_neck - bn_mean) * scale + bn_beta).reshape(1, E)        # (1, E)

    # ArcMarginProduct: F.normalize(weight) row-wise, pre-transposed to (E, C).
    w_n = w_head / jnp.maximum(
        jnp.sqrt(jnp.sum(w_head * w_head, axis=1, keepdims=True)), NORM_EPS)
    w_t = w_n.T                                                       # (E, C)

    # Pad batch rows up to the row tile; padded rows are sliced off at the end.
    Bp = pl.cdiv(B, tb) * tb
    if Bp != B:
        feats = jnp.pad(feats, ((0, Bp - B), (0, 0)))

    alpha_arr = jnp.asarray(prelu_alpha, jnp.float32).reshape(1)

    emb, embn = pl.pallas_call(
        neck_kernel,
        out_shape=(jax.ShapeDtypeStruct((Bp, E), jnp.float32),
                   jax.ShapeDtypeStruct((Bp, E), jnp.float32)),
        grid_spec=pltpu.PrefetchScalarGridSpec(
            num_scalar_prefetch=0,
            grid=(Bp // tb,),
            in_specs=[
                pl.BlockSpec((tb, F), lambda i: (i, 0)),              # backbone rows
                pl.BlockSpec((F, E), lambda i: (0, 0)),               # folded neck weight
                pl.BlockSpec((1, E), lambda i: (0, 0)),               # folded neck bias
                pl.BlockSpec(memory_space=pltpu.MemorySpace.SMEM),    # PReLU alpha
            ],
            out_specs=[pl.BlockSpec((tb, E), lambda i: (i, 0)),       # embeddings
                       pl.BlockSpec((tb, E), lambda i: (i, 0))],      # normalized embeddings
        ),
        compiler_params=pltpu.CompilerParams(
            dimension_semantics=("parallel",),
            vmem_limit_bytes=32 * 1024 * 1024),
    )(feats, w_f, b_f, alpha_arr)

    conf, cls = pl.pallas_call(
        head_kernel,
        out_shape=(jax.ShapeDtypeStruct((Bp, 1), jnp.float32),
                   jax.ShapeDtypeStruct((Bp, 1), jnp.int32)),
        grid_spec=pltpu.PrefetchScalarGridSpec(
            num_scalar_prefetch=0,
            grid=(Bp // tb, C // tc),
            in_specs=[pl.BlockSpec((tb, E), lambda b, c: (b, 0)),     # normalized embeddings
                      pl.BlockSpec((E, tc), lambda b, c: (0, c))],    # normalized head weight^T
            out_specs=[pl.BlockSpec((tb, 1), lambda b, c: (b, 0)),    # preds_conf
                       pl.BlockSpec((tb, 1), lambda b, c: (b, 0))],   # preds_cls
            scratch_shapes=[pltpu.VMEM((tb, 1), jnp.float32),         # running max
                            pltpu.VMEM((tb, 1), jnp.float32),         # running sum-exp
                            pltpu.VMEM((tb, 1), jnp.int32)],          # running argmax
        ),
        compiler_params=pltpu.CompilerParams(
            dimension_semantics=("parallel", "arbitrary"),
            vmem_limit_bytes=32 * 1024 * 1024),
    )(embn, w_t)

    return {
        "loss": jnp.zeros((1,), jnp.float32),   # eval path of the module
        "target": None,
        "preds_conf": conf[:B, 0],
        "preds_cls": cls[:B, 0],                # int32 (torch returns int64 indices)
        "embeddings": emb[:B],
    }


def _reference(feats, w_neck, b_neck, gamma, beta, mean, var, alpha, w_head):
    """Pure-JAX reference mirroring the PyTorch forward (inference BN, eval mode)."""
    h = feats @ w_neck.T + b_neck
    h = (h - mean) * jax.lax.rsqrt(var + BN_EPS) * gamma + beta
    emb = jnp.where(h > 0, h, alpha * h)
    nrm = jnp.sqrt(jnp.sum(emb * emb, axis=1, keepdims=True))
    embn = emb / jnp.maximum(nrm, NORM_EPS)
    w_n = w_head / jnp.maximum(
        jnp.sqrt(jnp.sum(w_head * w_head, axis=1, keepdims=True)), NORM_EPS)
    logits = embn @ w_n.T
    preds = jax.nn.softmax(logits, axis=1)
    conf = preds.max(axis=1)
    cls = jnp.argmax(logits, axis=1).astype(jnp.int32)
    return emb, conf, cls


if __name__ == "__main__":
    # Small test sizes consistent with the module: batch, backbone num_features,
    # embedding_size, n_classes.
    B, F, E, C = 8, 256, 128, 512

    key = jax.random.PRNGKey(0)
    ks = jax.random.split(key, 8)

    feats = jax.random.normal(ks[0], (B, F), jnp.float32)       # backbone output

    w_neck = jax.random.normal(ks[1], (E, F), jnp.float32) / jnp.sqrt(float(F))
    b_neck = 0.1 * jax.random.normal(ks[2], (E,), jnp.float32)
    gamma = 1.0 + 0.1 * jax.random.normal(ks[3], (E,), jnp.float32)
    beta = 0.1 * jax.random.normal(ks[4], (E,), jnp.float32)
    mean = 0.1 * jax.random.normal(ks[5], (E,), jnp.float32)
    var = jnp.abs(jax.random.normal(ks[6], (E,), jnp.float32)) + 0.5
    prelu_alpha = 0.25                                           # nn.PReLU() default
    w_head = jax.random.normal(ks[7], (C, E), jnp.float32) / jnp.sqrt(float(E))

    out = hybrid_swin_forward(feats, w_neck, b_neck, gamma, beta, mean, var,
                              prelu_alpha, w_head)
    jax.block_until_ready(out)

    ref_emb, ref_conf, ref_cls = _reference(feats, w_neck, b_neck, gamma, beta,
                                            mean, var, prelu_alpha, w_head)

    assert out["embeddings"].shape == (B, E)
    assert out["preds_conf"].shape == (B,)
    assert out["preds_cls"].shape == (B,)
    assert jnp.allclose(out["embeddings"], ref_emb, atol=1e-4, rtol=1e-4)
    assert jnp.allclose(out["preds_conf"], ref_conf, atol=1e-4, rtol=1e-4)
    assert jnp.array_equal(out["preds_cls"], ref_cls)
    assert float(out["loss"][0]) == 0.0

    print("KERNEL_OK")
</pallas_src>

<mosaic_0001>
module attributes {stable_mosaic.version = 11 : i64} {
  func.func @neck_kernel(%arg0: i32, %arg1: memref<8x256xf32, #tpu.memory_space<vmem>>, %arg2: memref<256x128xf32, #tpu.memory_space<vmem>>, %arg3: memref<1x128xf32, #tpu.memory_space<vmem>>, %arg4: memref<1xf32, #tpu.memory_space<smem>>, %arg5: memref<8x128xf32, #tpu.memory_space<vmem>>, %arg6: memref<8x128xf32, #tpu.memory_space<vmem>>) attributes {dimension_semantics = [#tpu.dimension_semantics<parallel>], iteration_bounds = array<i64: 1>, scalar_prefetch = 0 : i64, scratch_operands = 0 : i64, tpu.core_type = #tpu.core_type<tc>, window_params = [{transform_indices = @transform_0, window_bounds = array<i64: 8, 256>}, {pipeline_mode = #tpu.pipeline_mode<synchronous>, transform_indices = @transform_1, window_bounds = array<i64: 256, 128>}, {pipeline_mode = #tpu.pipeline_mode<synchronous>, transform_indices = @transform_2, window_bounds = array<i64: 1, 128>}, {transform_indices = @transform_3, window_bounds = array<i64: 1>}, {transform_indices = @transform_4, window_bounds = array<i64: 8, 128>}, {transform_indices = @transform_5, window_bounds = array<i64: 8, 128>}]} {
    %c0 = arith.constant 0 : index
    %c0_0 = arith.constant 0 : index
    %0 = vector.load %arg1[%c0, %c0_0] : memref<8x256xf32, #tpu.memory_space<vmem>>, vector<8x256xf32>
    %c0_1 = arith.constant 0 : index
    %c0_2 = arith.constant 0 : index
    %1 = vector.load %arg2[%c0_1, %c0_2] : memref<256x128xf32, #tpu.memory_space<vmem>>, vector<256x128xf32>
    %cst = arith.constant dense<0.000000e+00> : vector<8x128xf32>
    %2 = tpu.matmul %0, %1, %cst {dimension_numbers = #tpu.dot_dimension_numbers<[1], [0], [0], [1], [0, 0, 1, 1], [], []>} : vector<8x256xf32>, vector<256x128xf32>, vector<8x128xf32> -> vector<8x128xf32>
    %c0_3 = arith.constant 0 : index
    %c0_4 = arith.constant 0 : index
    %3 = vector.load %arg3[%c0_3, %c0_4] : memref<1x128xf32, #tpu.memory_space<vmem>>, vector<1x128xf32>
    %4 = vector.broadcast %3 : vector<1x128xf32> to vector<8x128xf32>
    %5 = arith.addf %2, %4 : vector<8x128xf32>
    %c0_5 = arith.constant 0 : index
    %6 = memref.load %arg4[%c0_5] : memref<1xf32, #tpu.memory_space<smem>>
    %cst_6 = arith.constant 0.000000e+00 : f32
    %7 = vector.broadcast %cst_6 : f32 to vector<8x128xf32>
    %8 = arith.cmpf ogt, %5, %7 : vector<8x128xf32>
    %9 = vector.broadcast %6 : f32 to vector<8x128xf32>
    %10 = arith.mulf %9, %5 : vector<8x128xf32>
    %11 = arith.select %8, %5, %10 : vector<8x128xi1>, vector<8x128xf32>
    %c0_7 = arith.constant 0 : index
    %c0_8 = arith.constant 0 : index
    %12 = vector.load %arg5[%c0_7, %c0_8] : memref<8x128xf32, #tpu.memory_space<vmem>>, vector<8x128xf32>
    tpu.vector_store %arg5[%c0_7, %c0_8], %11 {strides = array<i32>} : memref<8x128xf32, #tpu.memory_space<vmem>>, vector<8x128xf32>,
    %13 = arith.mulf %11, %11 : vector<8x128xf32>
    %cst_9 = arith.constant dense<0.000000e+00> : vector<8xf32>
    %14 = vector.multi_reduction <add>, %13, %cst_9 [1] : vector<8x128xf32> to vector<8xf32>
    %15 = vector.shape_cast %14 : vector<8xf32> to vector<8x1xf32>
    %16 = math.sqrt %15 : vector<8x1xf32>
    %cst_10 = arith.constant 9.99999996E-13 : f32
    %17 = vector.broadcast %cst_10 : f32 to vector<8x1xf32>
    %18 = arith.maximumf %16, %17 : vector<8x1xf32>
    %19 = vector.broadcast %18 : vector<8x1xf32> to vector<8x128xf32>
    %20 = arith.divf %11, %19 : vector<8x128xf32>
    %c0_11 = arith.constant 0 : index
    %c0_12 = arith.constant 0 : index
    %21 = vector.load %arg6[%c0_11, %c0_12] : memref<8x128xf32, #tpu.memory_space<vmem>>, vector<8x128xf32>
    tpu.vector_store %arg6[%c0_11, %c0_12], %20 {strides = array<i32>} : memref<8x128xf32, #tpu.memory_space<vmem>>, vector<8x128xf32>,
    return
  }
  func.func @transform_0(%arg0: i32) -> (i32, i32) {
    %c0_i32 = arith.constant 0 : i32
    %c0_i32_0 = arith.constant 0 : i32
    return %arg0, %c0_i32 : i32, i32
  }
  func.func @transform_1(%arg0: i32) -> (i32, i32) {
    %c0_i32 = arith.constant 0 : i32
    %c0_i32_0 = arith.constant 0 : i32
    %c0_i32_1 = arith.constant 0 : i32
    return %c0_i32, %c0_i32_0 : i32, i32
  }
  func.func @transform_2(%arg0: i32) -> (i32, i32) {
    %c0_i32 = arith.constant 0 : i32
    %c0_i32_0 = arith.constant 0 : i32
    %c0_i32_1 = arith.constant 0 : i32
    return %c0_i32, %c0_i32_0 : i32, i32
  }
  func.func @transform_3(%arg0: i32) -> i32 {
    %c0_i32 = arith.constant 0 : i32
    %c0_i32_0 = arith.constant 0 : i32
    return %c0_i32 : i32
  }
  func.func @transform_4(%arg0: i32) -> (i32, i32) {
    %c0_i32 = arith.constant 0 : i32
    %c0_i32_0 = arith.constant 0 : i32
    return %arg0, %c0_i32 : i32, i32
  }
  func.func @transform_5(%arg0: i32) -> (i32, i32) {
    %c0_i32 = arith.constant 0 : i32
    %c0_i32_0 = arith.constant 0 : i32
    return %arg0, %c0_i32 : i32, i32
  }
}

</mosaic_0001>

<bundles_post_ra>
// kernel: tpu_custom_call.1
= control target key start
LH: loop header
LB: loop body
LE: loop exit
PB: predicated region body
PF: predicated region fallthrough
CT: control target
= control target key end

     0   :  { %12 = vsyncpa [#allocation4], 0  ;;  %s397_s0 = inlined_call_operand.hbm [shape: f32[8,256], index: 0, kind: input, shape index: {}]   ;;  %s398_s1 = inlined_call_operand.hbm [shape: f32[256,128], index: 1, kind: input, shape index: {}]   ;;  %s399_s2 = inlined_call_operand.vmem [shape: f32[1,128], index: 2, kind: input, shape index: {}]   ;;  %s400_s3 = inlined_call_operand.<no memory space> [shape: f32[1], index: 3, kind: input, shape index: {}]   ;;  %s401_s4 = inlined_call_operand.hbm [shape: f32[8,128], index: 4, kind: output, shape index: {0}]   ;;  %s402_s5 = inlined_call_operand.hbm [shape: f32[8,128], index: 5, kind: output, shape index: {1}]  }
   0x1   :  { %13 = vsyncpa [#allocation7], 0 }
   0x2   :  { %14 = vsyncpa [#allocation5], 0 }
   0x3   :  { %15 = vsyncpa [#allocation10], 0  ;;  %s343_s18 = smov [#allocation3]   ;;  %s344_s20 = smov [#allocation6]  }
   0x4   :  { %s22_s19 = sshll.u32 %s343_s18, 4  ;;  %s31_s21 = sshll.u32 %s344_s20, 4  ;;  %s23_s19 = int_to_ptr.vmem [resolvable:$true] %s22_s19  ;;  %s32_s21 = int_to_ptr.vmem [resolvable:$true] %s31_s21 }
   0x5   :  { %s263_s22 = scalar_lea.vmem %s23_s19, 256  ;;  %p268_p1 = scmp.lt.s32.totalorder %s23_s19, %s23_s19 }
   0x6   :  { %p264_p0 = scmp.ne.s32.totalorder %s23_s19, %s263_s22  ;;  %p269_p2 = scmp.lt.s32.totalorder %s263_s22, %s263_s22 }
   0x8   :  { %p270_p3 = por %p269_p2, %p268_p1 }
   0xa   :  { %p271_p4 = pnand %p270_p3, %p264_p0 }
   0xc   :  { %274 = shalt.err (!%p271_p4)
}
   0xd   :  { %25 = dma.hbm_to_vmem [thread:$0]  %s397_s0, 256, %s23_s19, [#allocation4]  }
   0xe   :  { %s283_s25 = scalar_lea.vmem %s32_s21, 4096  ;;  %p288_p6 = scmp.lt.s32.totalorder %s32_s21, %s32_s21 }
   0xf   :  { %p284_p5 = scmp.ne.s32.totalorder %s32_s21, %s283_s25  ;;  %p289_p7 = scmp.lt.s32.totalorder %s283_s25, %s283_s25 }
  0x11   :  { %p290_p8 = por %p289_p7, %p288_p6 }
  0x13   :  { %p291_p9 = pnand %p290_p8, %p284_p5 }
  0x15   :  { %294 = shalt.err (!%p291_p9)
}
  0x16   :  { %s345_s26 = smov 128   ;;  %s346_s27 = smov 8  }
  0x17   :  { %37 = dma.hbm_to_vmem [thread:$0]  %s398_s1, 4096, %s32_s21, [#allocation7], %s345_s26, %s345_s26, %s346_s27  }
  0x18   :  { %335 = dma.done.wait [#allocation4], 256  }
  0x19   :  { %336 = vsyncadd [#allocation4], 4294967040 }
  0x1a   :  { %337 = dma.done.wait [#allocation7], 4096  }
  0x1b   :  { %338 = vsyncadd [#allocation7], 4294963200  ;;  %v81_v0 = vld [vmem:[#allocation6 + $0xf8] sm:$0xff]  ;;  %v80_v2 = vld [vmem:[#allocation6 + $0xf0] sm:$0xff]  ;;  %v161_v38 = vstv %s400_s3  ;;  %s347_s7 = smov [#allocation8]  }
  0x1c   :  { %v65_v1 = vld [vmem:[#allocation6 + $0x78] sm:$0xff]  ;;  %210 = vmatprep.subr.mxu0 %v81_v0  ;;  %v64_v3 = vld [vmem:[#allocation6 + $0x70] sm:$0xff]  ;;  %v79_v4 = vld [vmem:[#allocation6 + $0xe8] sm:$0xff]  ;;  %s185_s8 = sshll.u32 %s347_s7, 4  ;;  %s186_s8 = int_to_ptr.vmem [resolvable:$true] %s185_s8 }
  0x1d   :  { %211 = vmatpush3.msra.mxu0 %v65_v1  ;;  %v63_v5 = vld [vmem:[#allocation6 + $0x68] sm:$0xff]  ;;  %v78_v6 = vld [vmem:[#allocation6 + $0xe0] sm:$0xff]  ;;  %v77_v8 = vld [vmem:[#allocation6 + $0xd8] sm:$0xff]  ;;  %s295_s9 = scalar_lea.vmem %s186_s8, 128  ;;  %p300_p11 = scmp.lt.s32.totalorder %s186_s8, %s186_s8 }
  0x1e   :  { %212 = vmatprep.subr.mxu0 %v80_v2  ;;  %v62_v7 = vld [vmem:[#allocation6 + $0x60] sm:$0xff]  ;;  %v61_v9 = vld [vmem:[#allocation6 + $0x58] sm:$0xff]  ;;  %v76_v10 = vld [vmem:[#allocation6 + $0xd0] sm:$0xff]  ;;  %p296_p10 = scmp.ne.s32.totalorder %s186_s8, %s295_s9  ;;  %p301_p12 = scmp.lt.s32.totalorder %s295_s9, %s295_s9 }
  0x1f   :  { %213 = vmatpush3.msra.mxu0 %v64_v3  ;;  %v60_v11 = vld [vmem:[#allocation6 + $0x50] sm:$0xff]  ;;  %v75_v12 = vld [vmem:[#allocation6 + $0xc8] sm:$0xff]  ;;  %v49_v13 = vld [vmem:[#allocation3 + $0x8] sm:$0xff] }
  0x20   :  { %214 = vmatprep.subr.mxu0 %v79_v4  ;;  %v59_v14 = vld [vmem:[#allocation6 + $0x48] sm:$0xff]  ;;  %153 = vmatprep.mubr.f32.mxu0 %v49_v13  ;;  %v74_v15 = vld [vmem:[#allocation6 + $0xc0] sm:$0xff]  ;;  %v73_v17 = vld [vmem:[#allocation6 + $0xb8] sm:$0xff]  ;;  %p302_p13 = por %p301_p12, %p300_p11 }
  0x21   :  { %215 = vmatpush3.msra.mxu0 %v63_v5  ;;  %v58_v16 = vld [vmem:[#allocation6 + $0x40] sm:$0xff]  ;;  %v57_v18 = vld [vmem:[#allocation6 + $0x38] sm:$0xff]  ;;  %v72_v19 = vld [vmem:[#allocation6 + $0xb0] sm:$0xff] }
  0x22   :  { %216 = vmatprep.subr.mxu0 %v78_v6  ;;  %v56_v20 = vld [vmem:[#allocation6 + $0x30] sm:$0xff]  ;;  %v71_v21 = vld [vmem:[#allocation6 + $0xa8] sm:$0xff]  ;;  %v70_v23 = vld [vmem:[#allocation6 + $0xa0] sm:$0xff]  ;;  %p303_p0 = pnand %p302_p13, %p296_p10 }
  0x23   :  { %217 = vmatpush3.msra.mxu0 %v62_v7  ;;  %v55_v22 = vld [vmem:[#allocation6 + $0x28] sm:$0xff]  ;;  %v54_v24 = vld [vmem:[#allocation6 + $0x20] sm:$0xff]  ;;  %v69_v25 = vld [vmem:[#allocation6 + $0x98] sm:$0xff] }
  0x24   :  { %218 = vmatprep.subr.mxu0 %v77_v8  ;;  %v53_v26 = vld [vmem:[#allocation6 + $0x18] sm:$0xff]  ;;  %v68_v27 = vld [vmem:[#allocation6 + $0x90] sm:$0xff]  ;;  %v67_v29 = vld [vmem:[#allocation6 + $0x88] sm:$0xff] }
  0x25   :  { %219 = vmatpush3.msra.mxu0 %v61_v9  ;;  %v52_v28 = vld [vmem:[#allocation6 + $0x10] sm:$0xff]  ;;  %v51_v30 = vld [vmem:[#allocation6 + $0x8] sm:$0xff]  ;;  %v66_v31 = vld [vmem:[#allocation6 + $0x80] sm:$0xff] }
  0x26   :  { %220 = vmatprep.subr.mxu0 %v76_v10  ;;  %v50_v32 = vld [vmem:[#allocation6] sm:$0xff]  ;;  %v48_v33 = vld [vmem:[#allocation3] sm:$0xff] }
  0x27   :  { %221 = vmatpush3.msra.mxu0 %v60_v11  ;;  %v209_v35 = vld [vmem:[%s399_s2] ss:$0 sm:$0xff] }
  0x28   :  { %222 = vmatprep.subr.mxu0 %v75_v12 }
  0x29   :  { %223 = vmatpush3.msra.mxu0 %v59_v14 }
  0x2a   :  { %224 = vmatprep.subr.mxu0 %v74_v15 }
  0x2b   :  { %225 = vmatpush3.msra.mxu0 %v58_v16 }
  0x2c   :  { %226 = vmatprep.subr.mxu0 %v73_v17 }
  0x2d   :  { %227 = vmatpush3.msra.mxu0 %v57_v18 }
  0x2e   :  { %228 = vmatprep.subr.mxu0 %v72_v19 }
  0x2f   :  { %229 = vmatpush3.msra.mxu0 %v56_v20 }
  0x30   :  { %230 = vmatprep.subr.mxu0 %v71_v21 }
  0x31   :  { %231 = vmatpush3.msra.mxu0 %v55_v22 }
  0x32   :  { %232 = vmatprep.subr.mxu0 %v70_v23 }
  0x33   :  { %233 = vmatpush3.msra.mxu0 %v54_v24 }
  0x34   :  { %234 = vmatprep.subr.mxu0 %v69_v25 }
  0x35   :  { %235 = vmatpush3.msra.mxu0 %v53_v26 }
  0x36   :  { %236 = vmatprep.subr.mxu0 %v68_v27 }
  0x37   :  { %237 = vmatpush3.msra.mxu0 %v52_v28 }
  0x38   :  { %238 = vmatprep.subr.mxu0 %v67_v29 }
  0x39   :  { %239 = vmatpush3.msra.mxu0 %v51_v30 }
  0x3a   :  { %240 = vmatprep.subr.mxu0 %v66_v31 }
  0x3b   :  { %241 = vmatpush3.msra.mxu0 %v50_v32 }
  0x3c   :  { %154 = vmatmul.mubr.f32.vlgmr.msra.gmra.mxu0 %v48_v33 }
  0xfc   :  { %v242_v34 = vpop.f32.mrf.mxu0 }
  0xfe   :  { %v243_v36 = vpop.f32.mrf.mxu0 }
  0xff   :  { %v244_v37 = vadd.f32 %v243_v36, %v242_v34 }
 0x101   :  { %v156_v39 = vadd.f32 %v244_v37, %v209_v35 }
 0x103   :  { %vm160_vm0 = vcmp.gt.f32.partialorder %v156_v39, 0.0  ;;  %v162_v40 = vmul.f32 %v161_v38, %v156_v39 }
 0x105   :  { %v163_v41 = vsel %vm160_vm0, %v156_v39, %v162_v40 }
 0x106   :  { %v165_v42 = vmul.f32 %v163_v41, %v163_v41  ;;  %164 = vst [vmem:[#allocation8] sm:$0xff] %v163_v41 }
 0x108   :  { %166 = vadd.xlane.f32.xlu0 %v165_v42 }
 0x109   :  { %306 = shalt.err (!%p303_p0)
}
 0x10a   :  { %188 = dma.vmem_to_hbm [thread:$0]  %s186_s8, 128, %s401_s4, [#allocation5]  }
 0x10b   :  { %s348_s3 = smov [#allocation9]  }
 0x10c   :  { %s195_s11 = sshll.u32 %s348_s3, 4  ;;  %s196_s11 = int_to_ptr.vmem [resolvable:$true] %s195_s11 }
 0x10d   :  { %s315_s12 = scalar_lea.vmem %s196_s11, 128  ;;  %p320_p2 = scmp.lt.s32.totalorder %s196_s11, %s196_s11 }
 0x10e   :  { %p316_p1 = scmp.ne.s32.totalorder %s196_s11, %s315_s12  ;;  %p321_p3 = scmp.lt.s32.totalorder %s315_s12, %s315_s12 }
 0x110   :  { %p322_p4 = por %p321_p3, %p320_p2 }
 0x112   :  { %p323_p5 = pnand %p322_p4, %p316_p1 }
 0x191   :  { %v167_v43 = vpop.xlane.xlu0 %166 }
 0x192   :  { %251 = vrsqrt.f32 %v167_v43  ;;  %vm170_vm1 = vcmp.eq.f32.partialorder %v167_v43, inf  ;;  %v173_v46 = vand.u32 2147483648, %v167_v43  ;;  %vm172_vm2 = vcmp.eq.f32.partialorder %v167_v43, 0.0 }
 0x19f   :  { %v252_v44 = vpop.eup %251 }
 0x1a0   :  { %v169_v45 = vmul.f32 %v252_v44, %v167_v43 }
 0x1a2   :  { %v171_v47 = vsel %vm170_vm1, %v167_v43, %v169_v45 }
 0x1a3   :  { %v174_v48 = vsel %vm172_vm2, %v173_v46, %v171_v47 }
 0x1a4   :  { %v175_v49 = vmax.f32 %v174_v48, 1e-12 }
 0x1a6   :  { %253 = vrcp.f32 %v175_v49 }
 0x1b3   :  { %v254_v50 = vpop.eup %253 }
 0x1b4   :  { %v177_v51 = vmul.f32 %v254_v50, %v163_v41 }
 0x1b6   :  { %178 = vst [vmem:[#allocation9] sm:$0xff] %v177_v51 }
 0x1b7   :  { %326 = shalt.err (!%p323_p5)
}
 0x1b8   :  { %198 = dma.vmem_to_hbm [thread:$0]  %s196_s11, 128, %s402_s5, [#allocation10]  }
 0x1b9   :  { %339 = dma.done.wait [#allocation5], 128  }
 0x1ba   :  { %340 = vsyncadd [#allocation5], 4294967168 }
 0x1bb   :  { %341 = dma.done.wait [#allocation10], 128  }
 0x1bc   :  { %342 = vsyncadd [#allocation10], 4294967168 }
 0x1bd   :  { %205 = vsyncpa [#allocation4], 1 }
 0x1be   :  { %206 = vsyncpa [#allocation7], 1 }
 0x1bf   :  { %207 = vsyncpa [#allocation5], 1 }
 0x1c0   :  { %208 = vsyncpa [#allocation10], 1 }

</bundles_post_ra>
